<compile_context>
chip_gen: v6e
topology: v6e:2x2x1
jax: 0.10.0
libtpu: 0.0.40
codegen_flags: <defaults>
</compile_context>

<pallas_src>
import math

import jax
import jax.numpy as jnp
from jax.experimental import pallas as pl
from jax.experimental.pallas import tpu as pltpu

CONTEXT_LENGTH = 64
D_MODEL = 576

_LANE = 128
_SUBLANE = 8


# ---- pe buffer (init-time, mirrors PositionalEncoding.__init__) --------------
def make_positional_encoding(context_length, d_model, dtype=jnp.float32):
    position = jnp.arange(context_length, dtype=jnp.float32)[:, None]          # (S, 1)
    div_term = jnp.exp(
        jnp.arange(0, d_model, 2, dtype=jnp.float32) * (-math.log(10000.0) / d_model)
    )                                                                           # (D/2,)
    angles = position * div_term                                                # (S, D/2)
    pe = jnp.zeros((context_length, d_model), jnp.float32)
    pe = pe.at[:, 0::2].set(jnp.sin(angles))
    pe = pe.at[:, 1::2].set(jnp.cos(angles))
    return pe.astype(dtype)


# ---- kernel ------------------------------------------------------------------
def _add_pe_kernel(x_ref, pe_ref, o_ref):
    # x_ref/o_ref: (B, rows, 128) block;  pe_ref: (1, rows, 128), broadcast over batch.
    o_ref[...] = (x_ref[...] + pe_ref[...]).astype(o_ref.dtype)


def _pick_block_rows(rows, batch, itemsize):
    """Largest multiple-of-8 divisor of `rows` keeping the x block <= ~1 MiB,
    split once more if that leaves a single grid step (v7x has 2 TensorCores)."""
    cap = max(_SUBLANE, (1 << 20) // max(1, batch * _LANE * itemsize))
    cap = min(cap, rows)
    br = max(_SUBLANE, (cap // _SUBLANE) * _SUBLANE)
    while br > _SUBLANE and rows % br != 0:
        br -= _SUBLANE
    if rows % br != 0:
        br = rows                                   # full extent is always legal
    if rows // br < 2:                              # give both v7x TCs a tile
        half = ((rows // 2) // _SUBLANE) * _SUBLANE
        while half >= _SUBLANE and rows % half != 0:
            half -= _SUBLANE
        if half >= _SUBLANE:
            br = half
    return br


# ---- wrapper -----------------------------------------------------------------
def positional_encoding_forward(x, pe, *, donate_x=False):
    """out[b, s, :] = x[b, s, :] + pe[s, :]   for s < x.shape[1]."""
    B, S, D = x.shape
    assert pe.shape[0] >= S and pe.shape[1] == D, (pe.shape, x.shape)
    if pe.dtype != x.dtype:
        # Prefer building pe in the model dtype up front; cast once here otherwise.
        pe = pe.astype(x.dtype)

    itemsize = jnp.dtype(x.dtype).itemsize
    flat = S * D
    alias = {0: 0} if donate_x else {}

    if flat % _LANE == 0:
        # Lane/sublane-dense path: view (S, D) as (rows, 128); free bitcast reshape.
        rows = flat // _LANE
        block_rows = _pick_block_rows(rows, B, itemsize)
        x_r = x.reshape(B, rows, _LANE)
        pe_r = pe[:S].reshape(1, rows, _LANE)
        out = pl.pallas_call(
            _add_pe_kernel,
            out_shape=jax.ShapeDtypeStruct((B, rows, _LANE), x.dtype),
            grid=(rows // block_rows,),
            in_specs=[
                pl.BlockSpec((B, block_rows, _LANE), lambda r: (0, r, 0)),
                # batch folded into the block => each pe tile is DMA'd exactly once
                pl.BlockSpec((1, block_rows, _LANE), lambda r: (0, r, 0)),
            ],
            out_specs=pl.BlockSpec((B, block_rows, _LANE), lambda r: (0, r, 0)),
            input_output_aliases=alias,
            compiler_params=pltpu.CompilerParams(
                dimension_semantics=("parallel",)),
        )(x_r, pe_r)
        return out.reshape(B, S, D)

    # Fallback (S*D not a multiple of 128): one full block; every block dim equals
    # the array extent, so the BlockSpec is always legal.
    pe_r = pe[:S][None]                                              # (1, S, D)
    return pl.pallas_call(
        _add_pe_kernel,
        out_shape=jax.ShapeDtypeStruct((B, S, D), x.dtype),
        grid=(1,),
        in_specs=[
            pl.BlockSpec((B, S, D), lambda r: (0, 0, 0)),
            pl.BlockSpec((1, S, D), lambda r: (0, 0, 0)),
        ],
        out_specs=pl.BlockSpec((B, S, D), lambda r: (0, 0, 0)),
        input_output_aliases=alias,
        compiler_params=pltpu.CompilerParams(
            dimension_semantics=("arbitrary",)),
    )(x, pe_r)


# ---- demo / self-check -------------------------------------------------------
if __name__ == "__main__":
    key = jax.random.PRNGKey(0)

    B, S = 2, CONTEXT_LENGTH                       # x: (2, 64, 576)
    x = jax.random.normal(key, (B, S, D_MODEL), jnp.float32)
    pe = make_positional_encoding(CONTEXT_LENGTH, D_MODEL, dtype=x.dtype)

    out = jax.jit(positional_encoding_forward)(x, pe)
    out = jax.block_until_ready(out)

    assert out.shape == (B, S, D_MODEL), out.shape
    ref = x + pe[None, :S, :]                      # pure-JAX reference
    assert bool(jnp.allclose(out, ref, atol=1e-6, rtol=1e-6))
    assert bool(jnp.all(jnp.isfinite(out)))
    print("KERNEL_OK")
</pallas_src>

<mosaic_0001>
module attributes {stable_mosaic.version = 11 : i64} {
  func.func @_add_pe_kernel(%arg0: i32, %arg1: memref<2x144x128xf32, #tpu.memory_space<vmem>>, %arg2: memref<1x144x128xf32, #tpu.memory_space<vmem>>, %arg3: memref<2x144x128xf32, #tpu.memory_space<vmem>>) attributes {dimension_semantics = [#tpu.dimension_semantics<parallel>], iteration_bounds = array<i64: 2>, scalar_prefetch = 0 : i64, scratch_operands = 0 : i64, tpu.core_type = #tpu.core_type<tc>, window_params = [{transform_indices = @transform_0, window_bounds = array<i64: 2, 144, 128>}, {transform_indices = @transform_1, window_bounds = array<i64: 1, 144, 128>}, {transform_indices = @transform_2, window_bounds = array<i64: 2, 144, 128>}]} {
    %c0 = arith.constant 0 : index
    %c0_0 = arith.constant 0 : index
    %c0_1 = arith.constant 0 : index
    %0 = vector.load %arg1[%c0, %c0_0, %c0_1] : memref<2x144x128xf32, #tpu.memory_space<vmem>>, vector<2x144x128xf32>
    %c0_2 = arith.constant 0 : index
    %c0_3 = arith.constant 0 : index
    %c0_4 = arith.constant 0 : index
    %1 = vector.load %arg2[%c0_2, %c0_3, %c0_4] : memref<1x144x128xf32, #tpu.memory_space<vmem>>, vector<1x144x128xf32>
    %2 = vector.broadcast %1 : vector<1x144x128xf32> to vector<2x144x128xf32>
    %3 = arith.addf %0, %2 : vector<2x144x128xf32>
    %c0_5 = arith.constant 0 : index
    %c0_6 = arith.constant 0 : index
    %c0_7 = arith.constant 0 : index
    %4 = vector.load %arg3[%c0_5, %c0_6, %c0_7] : memref<2x144x128xf32, #tpu.memory_space<vmem>>, vector<2x144x128xf32>
    tpu.vector_store %arg3[%c0_5, %c0_6, %c0_7], %3 {strides = array<i32>} : memref<2x144x128xf32, #tpu.memory_space<vmem>>, vector<2x144x128xf32>,
    return
  }
  func.func @transform_0(%arg0: i32) -> (i32, i32, i32) {
    %c0_i32 = arith.constant 0 : i32
    %c0_i32_0 = arith.constant 0 : i32
    %c0_i32_1 = arith.constant 0 : i32
    return %c0_i32, %arg0, %c0_i32_0 : i32, i32, i32
  }
  func.func @transform_1(%arg0: i32) -> (i32, i32, i32) {
    %c0_i32 = arith.constant 0 : i32
    %c0_i32_0 = arith.constant 0 : i32
    %c0_i32_1 = arith.constant 0 : i32
    return %c0_i32, %arg0, %c0_i32_0 : i32, i32, i32
  }
  func.func @transform_2(%arg0: i32) -> (i32, i32, i32) {
    %c0_i32 = arith.constant 0 : i32
    %c0_i32_0 = arith.constant 0 : i32
    %c0_i32_1 = arith.constant 0 : i32
    return %c0_i32, %arg0, %c0_i32_0 : i32, i32, i32
  }
}

</mosaic_0001>

<bundles_post_ra>
// kernel: positional_encoding_forward.1
= control target key start
LH: loop header
LB: loop body
LE: loop exit
PB: predicated region body
PF: predicated region fallthrough
CT: control target
= control target key end

     0   :  { %s792_s9 = smov 0   ;;  %s794_s10 = smov 0   ;;  %s1146_s0 = inlined_call_operand.vmem [shape: f32[2,288,128], index: 0, kind: input, shape index: {}]   ;;  %s1147_s1 = inlined_call_operand.vmem [shape: f32[1,288,128], index: 1, kind: input, shape index: {}]   ;;  %s1148_s2 = inlined_call_operand.vmem [shape: f32[2,288,128], index: 2, kind: output, shape index: {}]  }
   0x1   :  { %s796_s11 = smov 0  }
   0x2 LB: > { %s808_s12 = sadd.s32 4294967295, %s775_s11   ;;  %s811_s13 = sadd.s32 1, %s775_s11   ;;  %s775_s11 = sphi %s796_s11, %s1152_s11   ;;  %s771_s10 = sphi %s794_s10, %s1151_s10   ;;  %s767_s9 = sphi %s792_s9, %s1150_s9  }
   0x3   : > { %s16_s14 = ssub.s32 %s775_s11, %s811_s13  ;;  %s19_s15 = sadd.s32 1, %s771_s10 }
   0x4   : > { %p17_p0 = scmp.eq.s32.totalorder %s16_s14, 0  ;;  %p26_p1 = scmp.ne.s32.totalorder %s771_s10, %s767_s9 }
   0x5   : > { %p27_p2 = scmp.eq.s32.totalorder %s775_s11, 0  ;;  %p82_p3 = scmp.eq.s32.totalorder %s808_s12, 1 }
   0x6   : > { %s821_s16 = scalar_select %p17_p0, %s771_s10, %s19_s15  }
   0x7   : > { %p28_p4 = por %p27_p2, %p26_p1  ;;  %p823_p5 = por %p82_p3, %p26_p1 }
   0x8   : > { %p718_p6 = scmp.ge.s32.totalorder %s775_s11, 2 }
   0xa   : > { %104 = sbr.rel (%p718_p6) target bundleno = 38 (0x26), region = 16 }
   0xf   : > { %107 = sbr.rel (!%p28_p4) target bundleno = 38 (0x26), region = 20  ;;  %s109_s18 = sand.u32 (%p28_p4), 1, %s771_s10  }
  0x10   : > { %s725_s19 = smul.u32 (%p28_p4), 144, %s775_s11 }
  0x11   : > { %s727_s20 = smul.u32 (%p28_p4), 288, %s109_s18 }
  0x12   : > { %s833_s23 = scalar_lea.vmem (%p28_p4), %s1146_s0, %s725_s19 }
  0x13   : > { %v213_v0 = vld [vmem:[%s833_s23] sm:$0xff] (%p28_p4)  ;;  %v215_v1 = vld [vmem:[%s833_s23 + $0x8] sm:$0xff] (%p28_p4)  ;;  %v217_v2 = vld [vmem:[%s833_s23 + $0x10] sm:$0xff] (%p28_p4)  ;;  %s838_s24 = scalar_lea.vmem (%p28_p4), [#allocation2], %s727_s20 }
  0x14   : > { %214 = vst [vmem:[%s838_s24] sm:$0xff] %v213_v0  ;;  %216 = vst [vmem:[%s838_s24 + $0x8] sm:$0xff] %v215_v1  ;;  %v219_v3 = vld [vmem:[%s833_s23 + $0x18] sm:$0xff]  ;;  %v221_v4 = vld [vmem:[%s833_s23 + $0x20] sm:$0xff] }
  0x15   : > { %218 = vst [vmem:[%s838_s24 + $0x10] sm:$0xff] %v217_v2  ;;  %v223_v5 = vld [vmem:[%s833_s23 + $0x28] sm:$0xff]  ;;  %220 = vst [vmem:[%s838_s24 + $0x18] sm:$0xff] %v219_v3  ;;  %v225_v6 = vld [vmem:[%s833_s23 + $0x30] sm:$0xff] }
  0x16   : > { %222 = vst [vmem:[%s838_s24 + $0x20] sm:$0xff] %v221_v4  ;;  %224 = vst [vmem:[%s838_s24 + $0x28] sm:$0xff] %v223_v5  ;;  %v227_v7 = vld [vmem:[%s833_s23 + $0x38] sm:$0xff]  ;;  %v229_v8 = vld [vmem:[%s833_s23 + $0x40] sm:$0xff] }
  0x17   : > { %226 = vst [vmem:[%s838_s24 + $0x30] sm:$0xff] %v225_v6  ;;  %228 = vst [vmem:[%s838_s24 + $0x38] sm:$0xff] %v227_v7  ;;  %v231_v9 = vld [vmem:[%s833_s23 + $0x48] sm:$0xff]  ;;  %v233_v10 = vld [vmem:[%s833_s23 + $0x50] sm:$0xff] }
  0x18   : > { %230 = vst [vmem:[%s838_s24 + $0x40] sm:$0xff] %v229_v8  ;;  %v235_v11 = vld [vmem:[%s833_s23 + $0x58] sm:$0xff]  ;;  %232 = vst [vmem:[%s838_s24 + $0x48] sm:$0xff] %v231_v9  ;;  %v237_v12 = vld [vmem:[%s833_s23 + $0x60] sm:$0xff] }
  0x19   : > { %234 = vst [vmem:[%s838_s24 + $0x50] sm:$0xff] %v233_v10  ;;  %236 = vst [vmem:[%s838_s24 + $0x58] sm:$0xff] %v235_v11  ;;  %v239_v13 = vld [vmem:[%s833_s23 + $0x68] sm:$0xff]  ;;  %v241_v14 = vld [vmem:[%s833_s23 + $0x70] sm:$0xff] }
  0x1a   : > { %238 = vst [vmem:[%s838_s24 + $0x60] sm:$0xff] %v237_v12  ;;  %240 = vst [vmem:[%s838_s24 + $0x68] sm:$0xff] %v239_v13  ;;  %v243_v15 = vld [vmem:[%s833_s23 + $0x78] sm:$0xff]  ;;  %v245_v16 = vld [vmem:[%s833_s23 + $0x80] sm:$0xff] }
  0x1b   : > { %242 = vst [vmem:[%s838_s24 + $0x70] sm:$0xff] %v241_v14  ;;  %v247_v17 = vld [vmem:[%s833_s23 + $0x88] sm:$0xff]  ;;  %244 = vst [vmem:[%s838_s24 + $0x78] sm:$0xff] %v243_v15  ;;  %v249_v18 = vld [vmem:[%s833_s23 + $0x120] sm:$0xff] }
  0x1c   : > { %246 = vst [vmem:[%s838_s24 + $0x80] sm:$0xff] %v245_v16  ;;  %248 = vst [vmem:[%s838_s24 + $0x88] sm:$0xff] %v247_v17  ;;  %v251_v19 = vld [vmem:[%s833_s23 + $0x128] sm:$0xff]  ;;  %v253_v20 = vld [vmem:[%s833_s23 + $0x130] sm:$0xff] }
  0x1d   : > { %250 = vst [vmem:[%s838_s24 + $0x90] sm:$0xff] %v249_v18  ;;  %252 = vst [vmem:[%s838_s24 + $0x98] sm:$0xff] %v251_v19  ;;  %v255_v21 = vld [vmem:[%s833_s23 + $0x138] sm:$0xff]  ;;  %v257_v22 = vld [vmem:[%s833_s23 + $0x140] sm:$0xff] }
  0x1e   : > { %254 = vst [vmem:[%s838_s24 + $0xa0] sm:$0xff] %v253_v20  ;;  %v259_v23 = vld [vmem:[%s833_s23 + $0x148] sm:$0xff]  ;;  %256 = vst [vmem:[%s838_s24 + $0xa8] sm:$0xff] %v255_v21  ;;  %v261_v24 = vld [vmem:[%s833_s23 + $0x150] sm:$0xff] }
  0x1f   : > { %258 = vst [vmem:[%s838_s24 + $0xb0] sm:$0xff] %v257_v22  ;;  %260 = vst [vmem:[%s838_s24 + $0xb8] sm:$0xff] %v259_v23  ;;  %v263_v25 = vld [vmem:[%s833_s23 + $0x158] sm:$0xff]  ;;  %v265_v26 = vld [vmem:[%s833_s23 + $0x160] sm:$0xff] }
  0x20   : > { %262 = vst [vmem:[%s838_s24 + $0xc0] sm:$0xff] %v261_v24  ;;  %264 = vst [vmem:[%s838_s24 + $0xc8] sm:$0xff] %v263_v25  ;;  %v267_v27 = vld [vmem:[%s833_s23 + $0x168] sm:$0xff]  ;;  %v269_v28 = vld [vmem:[%s833_s23 + $0x170] sm:$0xff] }
  0x21   : > { %266 = vst [vmem:[%s838_s24 + $0xd0] sm:$0xff] %v265_v26  ;;  %v271_v29 = vld [vmem:[%s833_s23 + $0x178] sm:$0xff]  ;;  %268 = vst [vmem:[%s838_s24 + $0xd8] sm:$0xff] %v267_v27  ;;  %v273_v30 = vld [vmem:[%s833_s23 + $0x180] sm:$0xff] }
  0x22   : > { %270 = vst [vmem:[%s838_s24 + $0xe0] sm:$0xff] %v269_v28  ;;  %272 = vst [vmem:[%s838_s24 + $0xe8] sm:$0xff] %v271_v29  ;;  %v275_v31 = vld [vmem:[%s833_s23 + $0x188] sm:$0xff]  ;;  %v277_v32 = vld [vmem:[%s833_s23 + $0x190] sm:$0xff] }
  0x23   : > { %274 = vst [vmem:[%s838_s24 + $0xf0] sm:$0xff] %v273_v30  ;;  %276 = vst [vmem:[%s838_s24 + $0xf8] sm:$0xff] %v275_v31  ;;  %v279_v33 = vld [vmem:[%s833_s23 + $0x198] sm:$0xff]  ;;  %v281_v34 = vld [vmem:[%s833_s23 + $0x1a0] sm:$0xff] }
  0x24   : > { %278 = vst [vmem:[%s838_s24 + $0x100] sm:$0xff] %v277_v32  ;;  %v283_v35 = vld [vmem:[%s833_s23 + $0x1a8] sm:$0xff]  ;;  %280 = vst [vmem:[%s838_s24 + $0x108] sm:$0xff] %v279_v33 }
  0x25   : > { %282 = vst [vmem:[%s838_s24 + $0x110] sm:$0xff] %v281_v34  ;;  %284 = vst [vmem:[%s838_s24 + $0x118] sm:$0xff] %v283_v35 }
  0x26 PF: > { %p720_p7 = scmp.ge.s32.totalorder %s775_s11, 1  ;;  %p298_p8 = scmp.lt.s32.totalorder %s775_s11, 3 }
  0x28   : > { %p299_p9 = pnand %p720_p7, %p298_p8 }
  0x29   : > { %s305_s25 = sand.u32 (!%p299_p9), 1, %s767_s9   ;;  %s331_s26 = smul.u32 (!%p299_p9), 18, %s808_s12 }
  0x2a   : > { %302 = sbr.rel (%p299_p9) target bundleno = 92 (0x5c), region = 62 }
  0x2b   : > { %s913_s27 = smul.u32 (!%p299_p9), 288, %s305_s25  ;;  %p332_p10 = scmp.lt.s32.totalorder (!%p299_p9), %s331_s26, 35 }
  0x2d   : > { %s916_s28 = scalar_lea.vmem (!%p299_p9), [#allocation2], %s913_s27  ;;  %s960_s5 = scalar_lea.vmem (!%p299_p9), [#allocation3], %s913_s27 }
  0x2f   : > { %s1154_s26 = smov (!%p332_p10, %s331_s26), 35  ;;  %v338_v36 = vld [vmem:[%s916_s28] sm:$0xff]  ;;  %v339_v37 = vld [vmem:[%s916_s28 + $0x8] sm:$0xff]  ;;  %v340_v38 = vld [vmem:[%s916_s28 + $0x10] sm:$0xff]  ;;  %s726_s6 = smul.u32 (%p823_p5), 144, %s808_s12 }
  0x30   : > { %v341_v39 = vld [vmem:[%s916_s28 + $0x18] sm:$0xff]  ;;  %v342_v40 = vld [vmem:[%s916_s28 + $0x20] sm:$0xff]  ;;  %v343_v41 = vld [vmem:[%s916_s28 + $0x28] sm:$0xff]  ;;  %s721_s29 = sshll.u32 %s1154_s26, 3 }
  0x31   : > { %v344_v42 = vld [vmem:[%s916_s28 + $0x30] sm:$0xff]  ;;  %v345_v43 = vld [vmem:[%s916_s28 + $0x38] sm:$0xff]  ;;  %v346_v44 = vld [vmem:[%s916_s28 + $0x40] sm:$0xff]  ;;  %s930_s4 = scalar_lea.vmem %s1147_s1, %s721_s29  ;;  %s1068_s9 = scalar_lea.vmem (%p823_p5), %s1148_s2, %s726_s6 }
  0x32   : > { %v347_v45 = vld [vmem:[%s916_s28 + $0x48] sm:$0xff]  ;;  %v348_v46 = vld [vmem:[%s916_s28 + $0x50] sm:$0xff]  ;;  %v349_v47 = vld [vmem:[%s916_s28 + $0x58] sm:$0xff] }
  0x33   : > { %v374_v48 = vld [vmem:[%s930_s4] sm:$0xff]  ;;  %v375_v49 = vld [vmem:[%s930_s4 + $0x8] sm:$0xff]  ;;  %v376_v50 = vld [vmem:[%s930_s4 + $0x10] sm:$0xff] }
  0x34   : > { %v392_v51 = vadd.f32 %v374_v48, %v338_v36  ;;  %v393_v52 = vadd.f32 %v375_v49, %v339_v37  ;;  %v394_v53 = vadd.f32 %v376_v50, %v340_v38  ;;  %v939_v54 = vld [vmem:[%s930_s4 + $0x18] sm:$0xff]  ;;  %v942_v55 = vld [vmem:[%s930_s4 + $0x20] sm:$0xff]  ;;  %v945_v56 = vld [vmem:[%s930_s4 + $0x28] sm:$0xff] }
  0x35   : > { %v395_v57 = vadd.f32 %v939_v54, %v341_v39  ;;  %v396_v58 = vadd.f32 %v942_v55, %v342_v40  ;;  %v397_v59 = vadd.f32 %v945_v56, %v343_v41  ;;  %v951_v60 = vld [vmem:[%s930_s4 + $0x30] sm:$0xff]  ;;  %v954_v61 = vld [vmem:[%s930_s4 + $0x38] sm:$0xff]  ;;  %v957_v62 = vld [vmem:[%s930_s4 + $0x40] sm:$0xff] }
  0x36   : > { %428 = vst [vmem:[%s960_s5] sm:$0xff] %v392_v51  ;;  %429 = vst [vmem:[%s960_s5 + $0x8] sm:$0xff] %v393_v52  ;;  %v398_v63 = vadd.f32 %v951_v60, %v344_v42  ;;  %v399_v0 = vadd.f32 %v954_v61, %v345_v43  ;;  %v400_v1 = vadd.f32 %v957_v62, %v346_v44  ;;  %v969_v2 = vld [vmem:[%s930_s4 + $0x48] sm:$0xff]  ;;  %v972_v3 = vld [vmem:[%s930_s4 + $0x50] sm:$0xff] }
  0x37   : > { %430 = vst [vmem:[%s960_s5 + $0x10] sm:$0xff] %v394_v53  ;;  %v975_v4 = vld [vmem:[%s930_s4 + $0x58] sm:$0xff]  ;;  %431 = vst [vmem:[%s960_s5 + $0x18] sm:$0xff] %v395_v57  ;;  %v401_v5 = vadd.f32 %v969_v2, %v347_v45  ;;  %v402_v6 = vadd.f32 %v972_v3, %v348_v46  ;;  %v350_v8 = vld [vmem:[%s916_s28 + $0x60] sm:$0xff] }
  0x38   : > { %432 = vst [vmem:[%s960_s5 + $0x20] sm:$0xff] %v396_v58  ;;  %433 = vst [vmem:[%s960_s5 + $0x28] sm:$0xff] %v397_v59  ;;  %v403_v7 = vadd.f32 %v975_v4, %v349_v47  ;;  %v985_v9 = vld [vmem:[%s930_s4 + $0x60] sm:$0xff]  ;;  %v351_v10 = vld [vmem:[%s916_s28 + $0x68] sm:$0xff] }
  0x39   : > { %434 = vst [vmem:[%s960_s5 + $0x30] sm:$0xff] %v398_v63  ;;  %435 = vst [vmem:[%s960_s5 + $0x38] sm:$0xff] %v399_v0  ;;  %v404_v11 = vadd.f32 %v985_v9, %v350_v8  ;;  %v387_v12 = vld [vmem:[%s930_s4 + $0x68] sm:$0xff]  ;;  %v352_v13 = vld [vmem:[%s916_s28 + $0x70] sm:$0xff] }
  0x3a   : > { %436 = vst [vmem:[%s960_s5 + $0x40] sm:$0xff] %v400_v1  ;;  %v388_v14 = vld [vmem:[%s930_s4 + $0x70] sm:$0xff]  ;;  %437 = vst [vmem:[%s960_s5 + $0x48] sm:$0xff] %v401_v5  ;;  %v405_v15 = vadd.f32 %v387_v12, %v351_v10  ;;  %v353_v17 = vld [vmem:[%s916_s28 + $0x78] sm:$0xff] }
  0x3b   : > { %438 = vst [vmem:[%s960_s5 + $0x50] sm:$0xff] %v402_v6  ;;  %439 = vst [vmem:[%s960_s5 + $0x58] sm:$0xff] %v403_v7  ;;  %v406_v16 = vadd.f32 %v388_v14, %v352_v13  ;;  %v389_v18 = vld [vmem:[%s930_s4 + $0x78] sm:$0xff]  ;;  %v354_v19 = vld [vmem:[%s916_s28 + $0x80] sm:$0xff] }
  0x3c   : > { %440 = vst [vmem:[%s960_s5 + $0x60] sm:$0xff] %v404_v11  ;;  %v407_v20 = vadd.f32 %v389_v18, %v353_v17  ;;  %v390_v21 = vld [vmem:[%s930_s4 + $0x80] sm:$0xff]  ;;  %v355_v22 = vld [vmem:[%s916_s28 + $0x88] sm:$0xff]  ;;  %441 = vst [vmem:[%s960_s5 + $0x68] sm:$0xff] %v405_v15 }
  0x3d   : > { %v391_v23 = vld [vmem:[%s930_s4 + $0x88] sm:$0xff]  ;;  %442 = vst [vmem:[%s960_s5 + $0x70] sm:$0xff] %v406_v16  ;;  %v408_v24 = vadd.f32 %v390_v21, %v354_v19  ;;  %v356_v26 = vld [vmem:[%s916_s28 + $0x90] sm:$0xff]  ;;  %v357_v27 = vld [vmem:[%s916_s28 + $0x98] sm:$0xff] }
  0x3e   : > { %v409_v25 = vadd.f32 %v391_v23, %v355_v22  ;;  %v358_v28 = vld [vmem:[%s916_s28 + $0xa0] sm:$0xff]  ;;  %443 = vst [vmem:[%s960_s5 + $0x78] sm:$0xff] %v407_v20  ;;  %v410_v29 = vadd.f32 %v374_v48, %v356_v26  ;;  %v411_v30 = vadd.f32 %v375_v49, %v357_v27  ;;  %v359_v32 = vld [vmem:[%s916_s28 + $0xa8] sm:$0xff]  ;;  %v360_v33 = vld [vmem:[%s916_s28 + $0xb0] sm:$0xff] }
  0x3f   : > { %v412_v31 = vadd.f32 %v376_v50, %v358_v28  ;;  %v361_v34 = vld [vmem:[%s916_s28 + $0xb8] sm:$0xff]  ;;  %444 = vst [vmem:[%s960_s5 + $0x80] sm:$0xff] %v408_v24  ;;  %v413_v35 = vadd.f32 %v939_v54, %v359_v32  ;;  %v414_v36 = vadd.f32 %v942_v55, %v360_v33  ;;  %v362_v38 = vld [vmem:[%s916_s28 + $0xc0] sm:$0xff]  ;;  %v363_v39 = vld [vmem:[%s916_s28 + $0xc8] sm:$0xff] }
  0x40   : > { %445 = vst [vmem:[%s960_s5 + $0x88] sm:$0xff] %v409_v25  ;;  %v415_v37 = vadd.f32 %v945_v56, %v361_v34  ;;  %v364_v40 = vld [vmem:[%s916_s28 + $0xd0] sm:$0xff]  ;;  %446 = vst [vmem:[%s960_s5 + $0x90] sm:$0xff] %v410_v29  ;;  %v416_v41 = vadd.f32 %v951_v60, %v362_v38  ;;  %v417_v42 = vadd.f32 %v954_v61, %v363_v39  ;;  %v365_v44 = vld [vmem:[%s916_s28 + $0xd8] sm:$0xff] }
  0x41   : > { %447 = vst [vmem:[%s960_s5 + $0x98] sm:$0xff] %v411_v30  ;;  %448 = vst [vmem:[%s960_s5 + $0xa0] sm:$0xff] %v412_v31  ;;  %v418_v43 = vadd.f32 %v957_v62, %v364_v40  ;;  %v366_v45 = vld [vmem:[%s916_s28 + $0xe0] sm:$0xff]  ;;  %v367_v46 = vld [vmem:[%s916_s28 + $0xe8] sm:$0xff]  ;;  %v419_v47 = vadd.f32 %v969_v2, %v365_v44 }
  0x42   : > { %449 = vst [vmem:[%s960_s5 + $0xa8] sm:$0xff] %v413_v35  ;;  %450 = vst [vmem:[%s960_s5 + $0xb0] sm:$0xff] %v414_v36  ;;  %v420_v48 = vadd.f32 %v972_v3, %v366_v45  ;;  %v421_v49 = vadd.f32 %v975_v4, %v367_v46  ;;  %v368_v50 = vld [vmem:[%s916_s28 + $0xf0] sm:$0xff]  ;;  %v369_v51 = vld [vmem:[%s916_s28 + $0xf8] sm:$0xff] }
  0x43   : > { %451 = vst [vmem:[%s960_s5 + $0xb8] sm:$0xff] %v415_v37  ;;  %v370_v52 = vld [vmem:[%s916_s28 + $0x100] sm:$0xff]  ;;  %452 = vst [vmem:[%s960_s5 + $0xc0] sm:$0xff] %v416_v41  ;;  %v422_v53 = vadd.f32 %v985_v9, %v368_v50  ;;  %v423_v54 = vadd.f32 %v387_v12, %v369_v51  ;;  %v371_v56 = vld [vmem:[%s916_s28 + $0x108] sm:$0xff] }
  0x44   : > { %453 = vst [vmem:[%s960_s5 + $0xc8] sm:$0xff] %v417_v42  ;;  %454 = vst [vmem:[%s960_s5 + $0xd0] sm:$0xff] %v418_v43  ;;  %v424_v55 = vadd.f32 %v388_v14, %v370_v52  ;;  %v372_v57 = vld [vmem:[%s916_s28 + $0x110] sm:$0xff]  ;;  %v373_v58 = vld [vmem:[%s916_s28 + $0x118] sm:$0xff]  ;;  %v425_v59 = vadd.f32 %v389_v18, %v371_v56 }
  0x45   : > { %455 = vst [vmem:[%s960_s5 + $0xd8] sm:$0xff] %v419_v47  ;;  %456 = vst [vmem:[%s960_s5 + $0xe0] sm:$0xff] %v420_v48  ;;  %v426_v60 = vadd.f32 %v390_v21, %v372_v57  ;;  %v427_v61 = vadd.f32 %v391_v23, %v373_v58  ;;  %470 = sbr.rel (!%p823_p5) target bundleno = 92 (0x5c), region = 70  ;;  %v572_v62 = vld [vmem:[%s960_s5] sm:$0xff] (%p823_p5)  ;;  %v574_v63 = vld [vmem:[%s960_s5 + $0x8] sm:$0xff] (%p823_p5) }
  0x46   : > { %457 = vst [vmem:[%s960_s5 + $0xe8] sm:$0xff] %v421_v49  ;;  %458 = vst [vmem:[%s960_s5 + $0xf0] sm:$0xff] %v422_v53  ;;  %v576_v0 = vld [vmem:[%s960_s5 + $0x10] sm:$0xff] (%p823_p5)  ;;  %v578_v1 = vld [vmem:[%s960_s5 + $0x18] sm:$0xff] (%p823_p5) }
  0x47   : > { %459 = vst [vmem:[%s960_s5 + $0xf8] sm:$0xff] %v423_v54  ;;  %460 = vst [vmem:[%s960_s5 + $0x100] sm:$0xff] %v424_v55  ;;  %v580_v2 = vld [vmem:[%s960_s5 + $0x20] sm:$0xff] (%p823_p5)  ;;  %v582_v3 = vld [vmem:[%s960_s5 + $0x28] sm:$0xff] (%p823_p5) }
  0x48   : > { %461 = vst [vmem:[%s960_s5 + $0x108] sm:$0xff] %v425_v59  ;;  %462 = vst [vmem:[%s960_s5 + $0x110] sm:$0xff] %v426_v60  ;;  %v584_v4 = vld [vmem:[%s960_s5 + $0x30] sm:$0xff] (%p823_p5)  ;;  %v586_v5 = vld [vmem:[%s960_s5 + $0x38] sm:$0xff] (%p823_p5) }
  0x49   : > { %463 = vst [vmem:[%s960_s5 + $0x118] sm:$0xff] %v427_v61  ;;  %v588_v6 = vld [vmem:[%s960_s5 + $0x40] sm:$0xff] (%p823_p5)  ;;  %573 = vst [vmem:[%s1068_s9] sm:$0xff] (%p823_p5), %v572_v62  ;;  %v590_v7 = vld [vmem:[%s960_s5 + $0x48] sm:$0xff] (%p823_p5) }
  0x4a   : > { %575 = vst [vmem:[%s1068_s9 + $0x8] sm:$0xff] %v574_v63  ;;  %577 = vst [vmem:[%s1068_s9 + $0x10] sm:$0xff] %v576_v0  ;;  %v592_v8 = vld [vmem:[%s960_s5 + $0x50] sm:$0xff]  ;;  %v594_v9 = vld [vmem:[%s960_s5 + $0x58] sm:$0xff] }
  0x4b   : > { %579 = vst [vmem:[%s1068_s9 + $0x18] sm:$0xff] %v578_v1  ;;  %581 = vst [vmem:[%s1068_s9 + $0x20] sm:$0xff] %v580_v2  ;;  %v596_v10 = vld [vmem:[%s960_s5 + $0x60] sm:$0xff]  ;;  %v598_v11 = vld [vmem:[%s960_s5 + $0x68] sm:$0xff] }
  0x4c   : > { %583 = vst [vmem:[%s1068_s9 + $0x28] sm:$0xff] %v582_v3  ;;  %585 = vst [vmem:[%s1068_s9 + $0x30] sm:$0xff] %v584_v4  ;;  %v600_v12 = vld [vmem:[%s960_s5 + $0x70] sm:$0xff]  ;;  %v602_v13 = vld [vmem:[%s960_s5 + $0x78] sm:$0xff] }
  0x4d   : > { %587 = vst [vmem:[%s1068_s9 + $0x38] sm:$0xff] %v586_v5  ;;  %589 = vst [vmem:[%s1068_s9 + $0x40] sm:$0xff] %v588_v6  ;;  %v604_v14 = vld [vmem:[%s960_s5 + $0x80] sm:$0xff]  ;;  %v606_v15 = vld [vmem:[%s960_s5 + $0x88] sm:$0xff] }
  0x4e   : > { %591 = vst [vmem:[%s1068_s9 + $0x48] sm:$0xff] %v590_v7  ;;  %593 = vst [vmem:[%s1068_s9 + $0x50] sm:$0xff] %v592_v8  ;;  %v608_v16 = vld [vmem:[%s960_s5 + $0x90] sm:$0xff]  ;;  %v610_v17 = vld [vmem:[%s960_s5 + $0x98] sm:$0xff] }
  0x4f   : > { %595 = vst [vmem:[%s1068_s9 + $0x58] sm:$0xff] %v594_v9  ;;  %597 = vst [vmem:[%s1068_s9 + $0x60] sm:$0xff] %v596_v10  ;;  %v612_v18 = vld [vmem:[%s960_s5 + $0xa0] sm:$0xff]  ;;  %v614_v19 = vld [vmem:[%s960_s5 + $0xa8] sm:$0xff] }
  0x50   : > { %599 = vst [vmem:[%s1068_s9 + $0x68] sm:$0xff] %v598_v11  ;;  %601 = vst [vmem:[%s1068_s9 + $0x70] sm:$0xff] %v600_v12  ;;  %v616_v20 = vld [vmem:[%s960_s5 + $0xb0] sm:$0xff]  ;;  %v618_v21 = vld [vmem:[%s960_s5 + $0xb8] sm:$0xff] }
  0x51   : > { %603 = vst [vmem:[%s1068_s9 + $0x78] sm:$0xff] %v602_v13  ;;  %605 = vst [vmem:[%s1068_s9 + $0x80] sm:$0xff] %v604_v14  ;;  %v620_v22 = vld [vmem:[%s960_s5 + $0xc0] sm:$0xff]  ;;  %v622_v23 = vld [vmem:[%s960_s5 + $0xc8] sm:$0xff] }
  0x52   : > { %607 = vst [vmem:[%s1068_s9 + $0x88] sm:$0xff] %v606_v15  ;;  %609 = vst [vmem:[%s1068_s9 + $0x120] sm:$0xff] %v608_v16  ;;  %v624_v24 = vld [vmem:[%s960_s5 + $0xd0] sm:$0xff]  ;;  %v626_v25 = vld [vmem:[%s960_s5 + $0xd8] sm:$0xff] }
  0x53   : > { %611 = vst [vmem:[%s1068_s9 + $0x128] sm:$0xff] %v610_v17  ;;  %613 = vst [vmem:[%s1068_s9 + $0x130] sm:$0xff] %v612_v18  ;;  %v628_v26 = vld [vmem:[%s960_s5 + $0xe0] sm:$0xff]  ;;  %v630_v27 = vld [vmem:[%s960_s5 + $0xe8] sm:$0xff] }
  0x54   : > { %615 = vst [vmem:[%s1068_s9 + $0x138] sm:$0xff] %v614_v19  ;;  %617 = vst [vmem:[%s1068_s9 + $0x140] sm:$0xff] %v616_v20  ;;  %v632_v28 = vld [vmem:[%s960_s5 + $0xf0] sm:$0xff]  ;;  %v634_v29 = vld [vmem:[%s960_s5 + $0xf8] sm:$0xff] }
  0x55   : > { %619 = vst [vmem:[%s1068_s9 + $0x148] sm:$0xff] %v618_v21  ;;  %621 = vst [vmem:[%s1068_s9 + $0x150] sm:$0xff] %v620_v22  ;;  %v636_v30 = vld [vmem:[%s960_s5 + $0x100] sm:$0xff]  ;;  %v638_v31 = vld [vmem:[%s960_s5 + $0x108] sm:$0xff] }
  0x56   : > { %623 = vst [vmem:[%s1068_s9 + $0x158] sm:$0xff] %v622_v23  ;;  %625 = vst [vmem:[%s1068_s9 + $0x160] sm:$0xff] %v624_v24  ;;  %v640_v32 = vld [vmem:[%s960_s5 + $0x110] sm:$0xff]  ;;  %v642_v33 = vld [vmem:[%s960_s5 + $0x118] sm:$0xff] }
  0x57   : > { %627 = vst [vmem:[%s1068_s9 + $0x168] sm:$0xff] %v626_v25  ;;  %629 = vst [vmem:[%s1068_s9 + $0x170] sm:$0xff] %v628_v26 }
  0x58   : > { %631 = vst [vmem:[%s1068_s9 + $0x178] sm:$0xff] %v630_v27  ;;  %633 = vst [vmem:[%s1068_s9 + $0x180] sm:$0xff] %v632_v28 }
  0x59   : > { %635 = vst [vmem:[%s1068_s9 + $0x188] sm:$0xff] %v634_v29  ;;  %637 = vst [vmem:[%s1068_s9 + $0x190] sm:$0xff] %v636_v30 }
  0x5a   : > { %639 = vst [vmem:[%s1068_s9 + $0x198] sm:$0xff] %v638_v31  ;;  %641 = vst [vmem:[%s1068_s9 + $0x1a0] sm:$0xff] %v640_v32 }
  0x5b   : > { %643 = vst [vmem:[%s1068_s9 + $0x1a8] sm:$0xff] %v642_v33 }
  0x5c PF: > { %p9_p11 = scmp.ge.s32.totalorder %s811_s13, 4   ;;  %s1150_s9 = smov %s771_s10 }
  0x5d   : > { %s1151_s10 = smov %s821_s16  ;;  %s1152_s11 = smov %s811_s13 }
  0x5e   :  { %11 = sbr.rel (!%p9_p11) target bundleno = 2 (0x2), region = 142 }

</bundles_post_ra>
